<compile_context>
chip_gen: v6e
topology: v6e:2x2x1
jax: 0.10.0
libtpu: 0.0.40
codegen_flags: <defaults>
</compile_context>

<pallas_src>
import functools

import jax
import jax.numpy as jnp
from jax.experimental import pallas as pl
from jax.experimental.pallas import tpu as pltpu


def _layer_dims(state_size):
    # (in_features, out_features) for layer1..layer5 of CriticNN.
    return ((state_size, 3), (3, 9), (9, 18), (18, 9), (9, 1))


def _round_up(x, m):
    return ((x + m - 1) // m) * m


def _slab_shape(state_size):
    dims = _layer_dims(state_size)
    rows = sum(2 * _round_up(n, 8) for _, n in dims)
    lanes = _round_up(max(state_size, max(n for _, n in dims)), 128)
    return (_round_up(rows, 8), lanes)


def pack_params(params, state_size):
    """Pack (W1,b1,...,W5,b5) into one f32 slab, feature-major (W^T rows) with
    8-row-aligned regions and each bias stored as a column.  Packed once,
    reused for every forward call -> a single resident-param DMA per step."""
    dims = _layer_dims(state_size)
    slab = jnp.zeros(_slab_shape(state_size), jnp.float32)
    it = iter(params)
    r = 0
    for k, n in dims:
        w = jnp.asarray(next(it), jnp.float32).reshape(k, n)
        b = jnp.asarray(next(it), jnp.float32).reshape(n)
        n_pad = _round_up(n, 8)
        slab = slab.at[r:r + n, 0:k].set(w.T)              # W^T region
        slab = slab.at[r + n_pad:r + n_pad + n, 0].set(b)  # bias column
        r += 2 * n_pad
    return slab


def _critic_kernel(batch_ref, x_ref, p_ref, out_ref, *, state_size, tile_b):
    """One batch-lane tile: 5-layer MLP (feature-major) + partial max."""
    dims = _layer_dims(state_size)
    h = x_ref[...]                                   # (state_size, tile_b) f32
    r = 0
    for li, (k, n) in enumerate(dims):
        n_pad = _round_up(n, 8)
        w_t = p_ref[r:r + n, 0:k]                    # (n, k)  static slab slice
        b = p_ref[r + n_pad:r + n_pad + n, 0:1]      # (n, 1)  bias column
        h = jnp.dot(w_t, h, preferred_element_type=jnp.float32) + b
        if li < len(dims) - 1:                       # ReLU on layers 1..4 only
            h = jnp.maximum(h, 0.0)
        r += 2 * n_pad
    # h: (1, tile_b) layer-5 outputs, batch on lanes.  Mask batch padding and
    # reduce to this block's partial max; the global max is finished outside.
    col = (pl.program_id(0) * tile_b
           + jax.lax.broadcasted_iota(jnp.int32, (1, tile_b), 1))
    v = jnp.where(col < batch_ref[0], h, -jnp.inf)
    out_ref[...] = jnp.broadcast_to(jnp.max(v), out_ref.shape)


def _choose_tile(batch, max_tile_b):
    if batch <= 128:
        return 128
    # >= 2 blocks whenever possible so the "parallel" grid axis can span both
    # TensorCores on v7x; the cap keeps VMEM use small on every generation.
    half = _round_up(-(-batch // 2), 128)
    return min(max_tile_b, half)


def critic_forward(state, param_slab, *, max_tile_b=4096):
    """CriticNN forward: relu(L1..L4) -> L5 -> .squeeze().max() over batch."""
    if state.ndim == 1:
        state = state[None, :]
    batch, state_size = state.shape
    if batch == 0:
        raise ValueError("CriticNN forward needs at least one state row.")

    tb = _choose_tile(batch, max_tile_b)
    b_pad = _round_up(batch, tb)
    num_blocks = b_pad // tb

    # Feature-major layout: features on sublanes, batch on the 128-lane axis.
    state_t = jnp.transpose(state).astype(jnp.float32)       # (state_size, B)
    if b_pad != batch:
        state_t = jnp.pad(state_t, ((0, 0), (0, b_pad - batch)))

    kernel = functools.partial(_critic_kernel, state_size=state_size, tile_b=tb)
    partials = pl.pallas_call(
        kernel,
        out_shape=jax.ShapeDtypeStruct((num_blocks, 1, 128), jnp.float32),
        grid_spec=pltpu.PrefetchScalarGridSpec(
            num_scalar_prefetch=1,
            grid=(num_blocks,),
            in_specs=[
                pl.BlockSpec((state_size, tb), lambda i, b_ref: (0, i)),   # state tile
                pl.BlockSpec(param_slab.shape, lambda i, b_ref: (0, 0)),   # resident params
            ],
            out_specs=pl.BlockSpec((1, 1, 128), lambda i, b_ref: (i, 0, 0)),
        ),
        compiler_params=pltpu.CompilerParams(
            dimension_semantics=("parallel",)),
    )(jnp.asarray([batch], jnp.int32), state_t, param_slab)
    # Trivial finish outside keeps the batch grid axis purely "parallel".
    return jnp.max(partials)


def init_params(key, state_size):
    sizes = list(_layer_dims(state_size))
    params = []
    keys = jax.random.split(key, 2 * len(sizes))
    for idx, (fan_in, fan_out) in enumerate(sizes):
        bound = 1.0 / jnp.sqrt(jnp.float32(fan_in))
        w = jax.random.uniform(keys[2 * idx], (fan_in, fan_out),
                               minval=-bound, maxval=bound, dtype=jnp.float32)
        b = jax.random.uniform(keys[2 * idx + 1], (1, fan_out),
                               minval=-bound, maxval=bound, dtype=jnp.float32)
        params += [w, b]
    return tuple(params)


def reference_forward(state, params):
    (w1, b1, w2, b2, w3, b3, w4, b4, w5, b5) = params
    dot = lambda a, b: jnp.dot(a, b, precision=jax.lax.Precision.HIGHEST)
    h = jnp.maximum(dot(state, w1) + b1, 0.0)
    h = jnp.maximum(dot(h, w2) + b2, 0.0)
    h = jnp.maximum(dot(h, w3) + b3, 0.0)
    h = jnp.maximum(dot(h, w4) + b4, 0.0)
    v = dot(h, w5) + b5
    return jnp.max(v)


if __name__ == "__main__":
    key = jax.random.PRNGKey(0)
    k_state, k_params = jax.random.split(key)

    batch = 2
    state_size = 16
    state = jax.random.normal(k_state, (batch, state_size), dtype=jnp.float32)
    params = init_params(k_params, state_size)
    slab = pack_params(params, state_size)            # pack once, reuse per call

    out = jax.block_until_ready(critic_forward(state, slab))
    ref = reference_forward(state, params)
    assert jnp.allclose(out, ref, atol=1e-4, rtol=1e-4), (out, ref)

    print("KERNEL_OK")
</pallas_src>

<mosaic_0001>
module attributes {stable_mosaic.version = 11 : i64} {
  func.func @_critic_kernel(%arg0: i32, %arg1: memref<1xi32, #tpu.memory_space<smem>>, %arg2: memref<16x128xf32, #tpu.memory_space<vmem>>, %arg3: memref<144x128xf32, #tpu.memory_space<vmem>>, %arg4: memref<1x1x128xf32, #tpu.memory_space<vmem>>) attributes {dimension_semantics = [#tpu.dimension_semantics<parallel>], iteration_bounds = array<i64: 1>, scalar_prefetch = 1 : i64, scratch_operands = 0 : i64, tpu.core_type = #tpu.core_type<tc>, window_params = [{transform_indices = @transform_0, window_bounds = array<i64: 16, 128>}, {pipeline_mode = #tpu.pipeline_mode<synchronous>, transform_indices = @transform_1, window_bounds = array<i64: 144, 128>}, {transform_indices = @transform_2, window_bounds = array<i64: 1, 1, 128>}]} {
    %c0 = arith.constant 0 : index
    %c0_0 = arith.constant 0 : index
    %0 = vector.load %arg2[%c0, %c0_0] : memref<16x128xf32, #tpu.memory_space<vmem>>, vector<16x128xf32>
    %c0_1 = arith.constant 0 : index
    %c0_2 = arith.constant 0 : index
    %1 = vector.load %arg3[%c0_1, %c0_2] : memref<144x128xf32, #tpu.memory_space<vmem>>, vector<3x16xf32>
    %c8 = arith.constant 8 : index
    %c0_3 = arith.constant 0 : index
    %2 = vector.load %arg3[%c8, %c0_3] : memref<144x128xf32, #tpu.memory_space<vmem>>, vector<3x1xf32>
    %cst = arith.constant dense<0.000000e+00> : vector<3x128xf32>
    %3 = tpu.matmul %1, %0, %cst {dimension_numbers = #tpu.dot_dimension_numbers<[1], [0], [0], [1], [0, 0, 1, 1], [], []>} : vector<3x16xf32>, vector<16x128xf32>, vector<3x128xf32> -> vector<3x128xf32>
    %4 = vector.broadcast %2 : vector<3x1xf32> to vector<3x128xf32>
    %5 = arith.addf %3, %4 : vector<3x128xf32>
    %cst_4 = arith.constant 0.000000e+00 : f32
    %6 = vector.broadcast %cst_4 : f32 to vector<3x128xf32>
    %7 = arith.maximumf %5, %6 : vector<3x128xf32>
    %c16 = arith.constant 16 : index
    %c0_5 = arith.constant 0 : index
    %8 = vector.load %arg3[%c16, %c0_5] : memref<144x128xf32, #tpu.memory_space<vmem>>, vector<9x3xf32>
    %c32 = arith.constant 32 : index
    %c0_6 = arith.constant 0 : index
    %9 = vector.load %arg3[%c32, %c0_6] : memref<144x128xf32, #tpu.memory_space<vmem>>, vector<9x1xf32>
    %cst_7 = arith.constant dense<0.000000e+00> : vector<9x128xf32>
    %10 = tpu.matmul %8, %7, %cst_7 {dimension_numbers = #tpu.dot_dimension_numbers<[1], [0], [0], [1], [0, 0, 1, 1], [], []>} : vector<9x3xf32>, vector<3x128xf32>, vector<9x128xf32> -> vector<9x128xf32>
    %11 = vector.broadcast %9 : vector<9x1xf32> to vector<9x128xf32>
    %12 = arith.addf %10, %11 : vector<9x128xf32>
    %cst_8 = arith.constant 0.000000e+00 : f32
    %13 = vector.broadcast %cst_8 : f32 to vector<9x128xf32>
    %14 = arith.maximumf %12, %13 : vector<9x128xf32>
    %c48 = arith.constant 48 : index
    %c0_9 = arith.constant 0 : index
    %15 = vector.load %arg3[%c48, %c0_9] : memref<144x128xf32, #tpu.memory_space<vmem>>, vector<18x9xf32>
    %c72 = arith.constant 72 : index
    %c0_10 = arith.constant 0 : index
    %16 = vector.load %arg3[%c72, %c0_10] : memref<144x128xf32, #tpu.memory_space<vmem>>, vector<18x1xf32>
    %cst_11 = arith.constant dense<0.000000e+00> : vector<18x128xf32>
    %17 = tpu.matmul %15, %14, %cst_11 {dimension_numbers = #tpu.dot_dimension_numbers<[1], [0], [0], [1], [0, 0, 1, 1], [], []>} : vector<18x9xf32>, vector<9x128xf32>, vector<18x128xf32> -> vector<18x128xf32>
    %18 = vector.broadcast %16 : vector<18x1xf32> to vector<18x128xf32>
    %19 = arith.addf %17, %18 : vector<18x128xf32>
    %cst_12 = arith.constant 0.000000e+00 : f32
    %20 = vector.broadcast %cst_12 : f32 to vector<18x128xf32>
    %21 = arith.maximumf %19, %20 : vector<18x128xf32>
    %c96 = arith.constant 96 : index
    %c0_13 = arith.constant 0 : index
    %22 = vector.load %arg3[%c96, %c0_13] : memref<144x128xf32, #tpu.memory_space<vmem>>, vector<9x18xf32>
    %c112 = arith.constant 112 : index
    %c0_14 = arith.constant 0 : index
    %23 = vector.load %arg3[%c112, %c0_14] : memref<144x128xf32, #tpu.memory_space<vmem>>, vector<9x1xf32>
    %cst_15 = arith.constant dense<0.000000e+00> : vector<9x128xf32>
    %24 = tpu.matmul %22, %21, %cst_15 {dimension_numbers = #tpu.dot_dimension_numbers<[1], [0], [0], [1], [0, 0, 1, 1], [], []>} : vector<9x18xf32>, vector<18x128xf32>, vector<9x128xf32> -> vector<9x128xf32>
    %25 = vector.broadcast %23 : vector<9x1xf32> to vector<9x128xf32>
    %26 = arith.addf %24, %25 : vector<9x128xf32>
    %cst_16 = arith.constant 0.000000e+00 : f32
    %27 = vector.broadcast %cst_16 : f32 to vector<9x128xf32>
    %28 = arith.maximumf %26, %27 : vector<9x128xf32>
    %c128 = arith.constant 128 : index
    %c0_17 = arith.constant 0 : index
    %29 = vector.load %arg3[%c128, %c0_17] : memref<144x128xf32, #tpu.memory_space<vmem>>, vector<1x9xf32>
    %c136 = arith.constant 136 : index
    %c0_18 = arith.constant 0 : index
    %30 = vector.load %arg3[%c136, %c0_18] : memref<144x128xf32, #tpu.memory_space<vmem>>, vector<1x1xf32>
    %cst_19 = arith.constant dense<0.000000e+00> : vector<1x128xf32>
    %31 = tpu.matmul %29, %28, %cst_19 {dimension_numbers = #tpu.dot_dimension_numbers<[1], [0], [0], [1], [0, 0, 1, 1], [], []>} : vector<1x9xf32>, vector<9x128xf32>, vector<1x128xf32> -> vector<1x128xf32>
    %32 = vector.broadcast %30 : vector<1x1xf32> to vector<1x128xf32>
    %33 = arith.addf %31, %32 : vector<1x128xf32>
    %c128_i32 = arith.constant 128 : i32
    %34 = arith.muli %arg0, %c128_i32 : i32
    %35 = tpu.iota {dimensions = array<i32: 1>} : vector<1x128xi32>
    %36 = vector.broadcast %34 : i32 to vector<1x128xi32>
    %37 = arith.addi %36, %35 : vector<1x128xi32>
    %c0_20 = arith.constant 0 : index
    %38 = memref.load %arg1[%c0_20] : memref<1xi32, #tpu.memory_space<smem>>
    %39 = vector.broadcast %38 : i32 to vector<1x128xi32>
    %40 = arith.cmpi slt, %37, %39 : vector<1x128xi32>
    %cst_21 = arith.constant 0xFF800000 : f32
    %41 = vector.broadcast %cst_21 : f32 to vector<1x128xf32>
    %42 = arith.select %40, %33, %41 : vector<1x128xi1>, vector<1x128xf32>
    %43 = vector.shape_cast %42 : vector<1x128xf32> to vector<1x1x128xf32>
    %cst_22 = arith.constant dense<0xFF800000> : vector<1xf32>
    %44 = vector.multi_reduction <maximumf>, %43, %cst_22 [1, 2] : vector<1x1x128xf32> to vector<1xf32>
    %45 = vector.shape_cast %44 : vector<1xf32> to vector<1x1x1xf32>
    %46 = vector.extract %45[0, 0, 0] : f32 from vector<1x1x1xf32>
    %47 = vector.broadcast %46 : f32 to vector<1x1x128xf32>
    %c0_23 = arith.constant 0 : index
    %c0_24 = arith.constant 0 : index
    %c0_25 = arith.constant 0 : index
    %48 = vector.load %arg4[%c0_23, %c0_24, %c0_25] : memref<1x1x128xf32, #tpu.memory_space<vmem>>, vector<1x1x128xf32>
    tpu.vector_store %arg4[%c0_23, %c0_24, %c0_25], %47 {strides = array<i32>} : memref<1x1x128xf32, #tpu.memory_space<vmem>>, vector<1x1x128xf32>,
    return
  }
  func.func @transform_0(%arg0: i32, %arg1: memref<1xi32, #tpu.memory_space<smem>>) -> (i32, i32) {
    %c0_i32 = arith.constant 0 : i32
    %c0_i32_0 = arith.constant 0 : i32
    return %c0_i32, %arg0 : i32, i32
  }
  func.func @transform_1(%arg0: i32, %arg1: memref<1xi32, #tpu.memory_space<smem>>) -> (i32, i32) {
    %c0_i32 = arith.constant 0 : i32
    %c0_i32_0 = arith.constant 0 : i32
    %c0_i32_1 = arith.constant 0 : i32
    return %c0_i32, %c0_i32_0 : i32, i32
  }
  func.func @transform_2(%arg0: i32, %arg1: memref<1xi32, #tpu.memory_space<smem>>) -> (i32, i32, i32) {
    %c0_i32 = arith.constant 0 : i32
    %c0_i32_0 = arith.constant 0 : i32
    %c0_i32_1 = arith.constant 0 : i32
    return %arg0, %c0_i32, %c0_i32_0 : i32, i32, i32
  }
}

</mosaic_0001>

<bundles_post_ra>
// kernel: tpu_custom_call.1
= control target key start
LH: loop header
LB: loop body
LE: loop exit
PB: predicated region body
PF: predicated region fallthrough
CT: control target
= control target key end

     0   :  { %9 = vsyncpa [#allocation5], 0  ;;  %s786_s0 = inlined_call_operand.<no memory space> [shape: s32[1], index: 0, kind: input, shape index: {}]   ;;  %s787_s1 = inlined_call_operand.hbm [shape: f32[16,128], index: 1, kind: input, shape index: {}]   ;;  %s788_s2 = inlined_call_operand.hbm [shape: f32[144,128], index: 2, kind: input, shape index: {}]   ;;  %s789_s3 = inlined_call_operand.hbm [shape: f32[1,1,128], index: 3, kind: output, shape index: {}]  }
   0x1   :  { %10 = vsyncpa [#allocation8], 0 }
   0x2   :  { %11 = vsyncpa [#allocation6], 0  ;;  %s719_s12 = smov [#allocation4]  }
   0x3   :  { %s17_s13 = sshll.u32 %s719_s12, 4  ;;  %s18_s13 = int_to_ptr.vmem [resolvable:$true] %s17_s13 }
   0x4   :  { %s661_s14 = scalar_lea.vmem %s18_s13, 256  ;;  %p666_p1 = scmp.lt.s32.totalorder %s18_s13, %s18_s13 }
   0x5   :  { %p662_p0 = scmp.ne.s32.totalorder %s18_s13, %s661_s14  ;;  %p667_p2 = scmp.lt.s32.totalorder %s661_s14, %s661_s14 }
   0x7   :  { %p668_p3 = por %p667_p2, %p666_p1 }
   0x9   :  { %p669_p4 = pnand %p668_p3, %p662_p0 }
   0xb   :  { %672 = shalt.err (!%p669_p4)
}
   0xc   :  { %s720_s15 = smov 128   ;;  %s721_s16 = smov 8  }
   0xd   :  { %23 = dma.hbm_to_vmem [thread:$0]  %s787_s1, 256, %s18_s13, [#allocation5], %s720_s15, %s720_s15, %s721_s16  }
   0xe   :  { %s722_s19 = smov [#allocation7]  }
   0xf   :  { %s29_s20 = sshll.u32 %s722_s19, 4  ;;  %s30_s20 = int_to_ptr.vmem [resolvable:$true] %s29_s20 }
  0x10   :  { %s681_s21 = scalar_lea.vmem %s30_s20, 2304  ;;  %p686_p6 = scmp.lt.s32.totalorder %s30_s20, %s30_s20 }
  0x11   :  { %p682_p5 = scmp.ne.s32.totalorder %s30_s20, %s681_s21  ;;  %p687_p7 = scmp.lt.s32.totalorder %s681_s21, %s681_s21 }
  0x13   :  { %p688_p8 = por %p687_p7, %p686_p6 }
  0x15   :  { %p689_p9 = pnand %p688_p8, %p682_p5 }
  0x17   :  { %692 = shalt.err (!%p689_p9)
}
  0x18   :  { %35 = dma.hbm_to_vmem [thread:$0]  %s788_s2, 2304, %s30_s20, [#allocation8], %s720_s15, %s720_s15, %s721_s16  }
  0x19   :  { %713 = dma.done.wait [#allocation5], 256  }
  0x1a   :  { %714 = vsyncadd [#allocation5], 4294967040 }
  0x1b   :  { %715 = dma.done.wait [#allocation8], 2304  }
  0x1c   :  { %716 = vsyncadd [#allocation8], 4294964992  ;;  %v723_v0 = vmov 0.0   ;;  %vm724_vm0 = vmmov 0   ;;  %v725_v1 = vmov 0   ;;  %v43_v2 = vld [vmem:[#allocation4 + $0x8] sm:$0xff]  ;;  %v532_v58 = vlaneseq }
  0x1d   :  { %600 = vmatprep.subr.mxu0 %v723_v0  ;;  %604 = vmatprep.mubr.msk.f32.mxu0 %vm724_vm0, %v723_v0  ;;  %v42_v3 = vld [vmem:[#allocation4] sm:$0xff]  ;;  %v44_v4 = vld [vmem:[#allocation7] sm:$0x7]  ;;  %vm51_vm1 = vcmask 130048   ;;  %v45_v5 = vld [vmem:[#allocation7 + $0x8] sm:$0x7]  ;;  %v537_v60 = vstv %s786_s0 }
  0x1e   :  { %651 = vset.pattern.permute.xlu0 %v725_v1  ;;  %652 = vset.pattern.permute.xlu1 %v725_v1  ;;  %v129_v6 = vld [vmem:[#allocation7 + $0x28] sm:$0x1]  ;;  %v232_v7 = vld [vmem:[#allocation7 + $0x50] sm:$0xff]  ;;  %v349_v8 = vld [vmem:[#allocation7 + $0x78] sm:$0x1]  ;;  %vm140_vm2 = vcmask 23552  }
  0x1f   :  { %601 = vmatpush3.msra.mxu0 %v43_v2  ;;  %48 = vperm.xlu0 %651, %v45_v5   ;;  %v449_v9 = vld [vmem:[#allocation7 + $0x88] sm:$0x1]  ;;  %v126_v10 = vld [vmem:[#allocation7 + $0x10] sm:$0xff]  ;;  %v128_v11 = vld [vmem:[#allocation7 + $0x20] sm:$0xff]  ;;  %vm147_vm3 = vcmask 1042432   ;;  %vm259_vm4 = vcmask 1040384  }
  0x20   :  { %602 = vmatprep.subr.mxu0 %v723_v0  ;;  %609 = vmatprep.mubr.msk.f32.mxu1 %vm140_vm2, %v126_v10  ;;  %v233_v12 = vld [vmem:[#allocation7 + $0x58] sm:$0x3]  ;;  %v231_v13 = vld [vmem:[#allocation7 + $0x48] sm:$0xff]  ;;  %v348_v14 = vld [vmem:[#allocation7 + $0x70] sm:$0xff]  ;;  %vm249_vm5 = vcmask 72704   ;;  %vm360_vm6 = vcmask 146432  }
  0x21   :  { %603 = vmatpush3.msra.mxu0 %v42_v3  ;;  %132 = vperm.xlu1 %652, %v128_v11   ;;  %v127_v20 = vld [vmem:[#allocation7 + $0x18] sm:$0x1]  ;;  %v228_v29 = vld [vmem:[#allocation7 + $0x30] sm:$0xff]  ;;  %v230_v31 = vld [vmem:[#allocation7 + $0x40] sm:$0x3]  ;;  %vm367_vm7 = vcmask 1041408  }
  0x22   :  { %605 = vmatmul.mubr.msk.f32.vlgmr.msra.gmra.mxu0 %vm51_vm1, %v44_v4  ;;  %v229_v30 = vld [vmem:[#allocation7 + $0x38] sm:$0xff]  ;;  %v346_v32 = vld [vmem:[#allocation7 + $0x60] sm:$0xff]  ;;  %v347_v48 = vld [vmem:[#allocation7 + $0x68] sm:$0x1]  ;;  %v533_v59 = vand.u32 127, %v532_v58  ;;  %s726_s24 = smov [#allocation9]  }
  0x23   :  { %137 = vperm.xlu0 %651, %v129_v6   ;;  %631 = vmatprep.mubr.msk.f32.mxu0 %vm360_vm6, %v346_v32  ;;  %v448_v57 = vld [vmem:[#allocation7 + $0x80] sm:$0x1]  ;;  %s558_s25 = sshll.u32 %s726_s24, 4  ;;  %s559_s25 = int_to_ptr.vmem [resolvable:$true] %s558_s25 }
  0x24   :  { %vm538_vm8 = vcmp.lt.s32.totalorder %v533_v59, %v537_v60  ;;  %s693_s26 = scalar_lea.vmem %s559_s25, 16  ;;  %s697_s27 = scalar_lea.vmem %s559_s25, 32 }
  0x25   :  { %246 = vperm.xlu1 %652, %v233_v12   ;;  %p694_p10 = scmp.ne.s32.totalorder %s559_s25, %s693_s26  ;;  %p698_p11 = scmp.lt.s32.totalorder %s559_s25, %s559_s25 }
  0x26   :  { %p699_p12 = scmp.lt.s32.totalorder %s697_s27, %s693_s26 }
  0x27   :  { %241 = vperm.xlu0 %651, %v232_v7  }
  0x28   :  { %p700_p13 = por %p699_p12, %p698_p11 }
  0x29   :  { %236 = vperm.xlu1 %652, %v231_v13  }
  0x2a   :  { %p701_p0 = pnand %p700_p13, %p694_p10 }
  0x2b   :  { %357 = vperm.xlu0 %651, %v349_v8  }
  0x2d   :  { %352 = vperm.xlu1 %652, %v348_v14  }
  0x2f   :  { %452 = vperm.xlu0 %651, %v449_v9  }
  0x9a   :  { %v49_v15 = vpop.permute.xlu0 %48 }
  0x9c   :  { %v133_v24 = vpop.permute.xlu1 %132 }
  0x9e   :  { %v138_v21 = vpop.permute.xlu0 %137 }
  0xa0   :  { %v247_v35 = vpop.permute.xlu1 %246 }
  0xa2   :  { %v242_v38 = vpop.permute.xlu0 %241 }
  0xa4   :  { %v237_v42 = vpop.permute.xlu1 %236 }
  0xa6   :  { %v358_v49 = vpop.permute.xlu0 %357 }
  0xa8   :  { %v353_v52 = vpop.permute.xlu1 %352 }
  0xaa   :  { %v453_v61 = vpop.permute.xlu0 %452 }
  0xe2   :  { %v121_v16 = vpop.f32.mrf.mxu0 }
  0xe3   :  { %v122_v17 = vadd.f32 %v121_v16, %v49_v15 }
  0xe4   :  { %v606_v18 = vpop.f32.mrf.mxu0 }
  0xe5   :  { %v125_v19 = vmax.f32 %v122_v17, 0.0 }
  0xe7   :  { %607 = vmatprep.subr.msk.mxu1 %vm147_vm3, %v125_v19 }
  0xe8   :  { %608 = vmatpush3.msk.msra.mxu1 %vm147_vm3, %v125_v19 }
  0xe9   :  { %610 = vmatmul.mubr.msk.f32.vlgmr.msra.gmra.mxu1 %vm140_vm2, %v127_v20  ;;  %612 = vmatprep.subr.mxu1 %v723_v0 }
  0xea   :  { %616 = vmatprep.mubr.msk.f32.mxu1 %vm724_vm0, %v723_v0 }
 0x1a9   :  { %v611_v22 = vpop.f32.mrf.mxu1 }
 0x1aa   :  { %v223_v23 = vadd.f32 %v611_v22, %v138_v21 }
 0x1ab   :  { %v217_v25 = vpop.f32.mrf.mxu1 }
 0x1ac   :  { %v227_v26 = vmax.f32 %v223_v23, 0.0  ;;  %v218_v27 = vadd.f32 %v217_v25, %v133_v24 }
 0x1ae   :  { %v226_v28 = vmax.f32 %v218_v27, 0.0  ;;  %613 = vmatpush3.msk.msra.mxu1 %vm259_vm4, %v227_v26 }
 0x1af   :  { %614 = vmatprep.subr.mxu1 %v723_v0 }
 0x1b0   :  { %615 = vmatpush3.msra.mxu1 %v226_v28 }
 0x1b1   :  { %617 = vmatmul.mubr.msk.f32.vlgmr.msra.gmra.mxu1 %vm249_vm5, %v228_v29 }
 0x1b2   :  { %619 = vmatprep.mubr.msk.f32.mxu1 %vm724_vm0, %v723_v0 }
 0x1b5   :  { %620 = vmatmul.mubr.msk.f32.gmra.mxu1 %vm249_vm5, %v229_v30 }
 0x1b6   :  { %622 = vmatprep.mubr.msk.f32.mxu1 %vm724_vm0, %v723_v0 }
 0x1b9   :  { %623 = vmatmul.mubr.msk.f32.gmra.mxu1 %vm249_vm5, %v230_v31 }
 0x271   :  { %v329_v33 = vpop.f32.mrf.mxu1 }
 0x272   :  { %v330_v44 = vadd.f32 %v329_v33, %v237_v42 }
 0x273   :  { %v618_v34 = vpop.f32.mrf.mxu1 }
 0x274   :  { %v343_v47 = vmax.f32 %v330_v44, 0.0 }
 0x275   :  { %v334_v36 = vpop.f32.mrf.mxu1 }
 0x276   :  { %v335_v40 = vadd.f32 %v334_v36, %v242_v38 }
 0x277   :  { %v621_v37 = vpop.f32.mrf.mxu1 }
 0x278   :  { %v344_v46 = vmax.f32 %v335_v40, 0.0 }
 0x279   :  { %v339_v39 = vpop.f32.mrf.mxu1 }
 0x27a   :  { %v340_v41 = vadd.f32 %v339_v39, %v247_v35 }
 0x27b   :  { %v624_v43 = vpop.f32.mrf.mxu1 }
 0x27c   :  { %v345_v45 = vmax.f32 %v340_v41, 0.0 }
 0x27e   :  { %625 = vmatprep.subr.msk.mxu0 %vm367_vm7, %v345_v45 }
 0x27f   :  { %626 = vmatpush3.msk.msra.mxu0 %vm367_vm7, %v345_v45 }
 0x280   :  { %627 = vmatprep.subr.mxu0 %v344_v46 }
 0x281   :  { %628 = vmatpush3.msra.mxu0 %v344_v46 }
 0x282   :  { %629 = vmatprep.subr.mxu0 %v343_v47 }
 0x283   :  { %630 = vmatpush3.msra.mxu0 %v343_v47 }
 0x284   :  { %632 = vmatmul.mubr.msk.f32.vlgmr.msra.gmra.mxu0 %vm360_vm6, %v347_v48  ;;  %634 = vmatprep.subr.mxu0 %v723_v0 }
 0x285   :  { %638 = vmatprep.mubr.msk.f32.mxu0 %vm724_vm0, %v723_v0 }
 0x344   :  { %v633_v50 = vpop.f32.mrf.mxu0 }
 0x345   :  { %v443_v51 = vadd.f32 %v633_v50, %v358_v49 }
 0x346   :  { %v437_v53 = vpop.f32.mrf.mxu0 }
 0x347   :  { %v447_v54 = vmax.f32 %v443_v51, 0.0  ;;  %v438_v55 = vadd.f32 %v437_v53, %v353_v52 }
 0x349   :  { %v446_v56 = vmax.f32 %v438_v55, 0.0  ;;  %635 = vmatpush3.msk.msra.mxu0 %vm259_vm4, %v447_v54 }
 0x34a   :  { %636 = vmatprep.subr.mxu0 %v723_v0 }
 0x34b   :  { %637 = vmatpush3.msra.mxu0 %v446_v56 }
 0x34c   :  { %639 = vmatmul.mubr.msk.f32.vlgmr.msra.gmra.mxu0 %vm249_vm5, %v448_v57 }
 0x40c   :  { %v527_v62 = vpop.f32.mrf.mxu0 }
 0x40d   :  { %v528_v63 = vadd.f32 %v527_v62, %v453_v61 }
 0x40e   :  { %v640_v1 = vpop.f32.mrf.mxu0 }
 0x40f   :  { %v539_v2 = vsel %vm538_vm8, %v528_v63, -inf }
 0x410   :  { %v540_v3 = vsel %vm259_vm4, %v539_v2, -inf }
 0x411   :  { %541 = vmax.xlane.f32.xlu1 %v540_v3 }
 0x49a   :  { %v542_v4 = vpop.xlane.xlu1 %541 }
 0x49b   :  { %v543_v0 = vrot.slane %v542_v4, 4 }
 0x49d   :  { %v544_v5 = vmax.f32 %v542_v4, %v543_v0 }
 0x49f   :  { %v545_v6 = vrot.slane %v544_v5, 2 }
 0x4a1   :  { %v546_v7 = vmax.f32 %v544_v5, %v545_v6 }
 0x4a3   :  { %v547_v8 = vrot.slane %v546_v7, 1 }
 0x4a5   :  { %v548_v9 = vmax.f32 %v546_v7, %v547_v8 }
 0x4a7   :  { %641 = vpush %v548_v9 }
 0x4d8   :  { %s642_s0 = spop %641 }
 0x4d9   :  { %v550_v10 = vstv %s642_s0 }
 0x4da   :  { %551 = vst [vmem:[#allocation9] sm:$0x1] %v550_v10 }
 0x4db   :  { %704 = shalt.err (!%p701_p0)
}
 0x4dc   :  { %561 = dma.vmem_to_hbm [thread:$0]  %s559_s25, 16, %s789_s3, [#allocation6]  }
 0x4dd   :  { %717 = dma.done.wait [#allocation6], 16  }
 0x4de   :  { %718 = vsyncadd [#allocation6], 4294967280 }
 0x4df   :  { %565 = vsyncpa [#allocation5], 1 }
 0x4e0   :  { %566 = vsyncpa [#allocation8], 1 }
 0x4e1   :  { %567 = vsyncpa [#allocation6], 1 }

</bundles_post_ra>
